<compile_context>
chip_gen: v7x
topology: tpu7x:2x2x1
jax: 0.10.0
libtpu: 0.0.40
codegen_flags: <defaults>
</compile_context>

<pallas_src>
import jax
import jax.numpy as jnp
import numpy as np
from jax.experimental import pallas as pl
from jax.experimental.pallas import tpu as pltpu


def _copy_kernel(x_ref, o_ref):
    # Whole-tile vreg-wide copy (VMEM in -> VMEM out), pipelined by BlockSpec.
    o_ref[...] = x_ref[...]


_LANE = 128
_MAX_COLS = 8192
# Above this size we force >= 2 grid blocks so both v7x TensorCores get work.
_SPLIT_THRESHOLD_BYTES = 2 * 1024 * 1024


def _tpu_vmem_bytes() -> int:
    """Best-effort query of per-core VMEM capacity; conservative fallback."""
    try:
        info = pltpu.get_tpu_info()
        for attr in ("vmem_capacity_bytes", "vmem_size_bytes", "vmem_bytes"):
            v = getattr(info, attr, None)
            if v:
                return int(v)
    except Exception:
        pass
    return 64 * 1024 * 1024  # v7x-sized VMEM (the smallest of the targets)


def _vmem_budget():
    """Returns (per-buffer tile cap bytes, scoped vmem limit bytes)."""
    vmem = _tpu_vmem_bytes()
    if vmem >= 100 * 1024 * 1024:            # v5e / v6e: 128 MiB physical VMEM
        return 8 * 1024 * 1024, 64 * 1024 * 1024
    return 4 * 1024 * 1024, 32 * 1024 * 1024  # v7x: 64 MiB physical VMEM


def _choose_layout(total: int, itemsize: int):
    """Pick a lane-dense (rows, cols) 2D layout; rows % sublane == 0, cols % 128 == 0.

    Pads the flat element count up to a multiple of (sublane * 128) so no
    masked partial stores and no oversized single-block fallback are needed.
    """
    sublane = max(8, 32 // itemsize)          # 8 f32 / 16 bf16 / 32 int8-fp8
    quantum = sublane * _LANE
    padded = -(-total // quantum) * quantum
    cols = _LANE
    c = _LANE * 2
    while c <= _MAX_COLS:                      # widest legal lane width wins
        if padded % c == 0 and (padded // c) % sublane == 0:
            cols = c
        c *= 2
    return padded, padded // cols, cols, sublane


def _identity_copy_2d(x2: jax.Array, sublane: int) -> jax.Array:
    """Identity copy of a lane-dense 2D slab through VMEM."""
    rows, cols = x2.shape
    itemsize = jnp.dtype(x2.dtype).itemsize
    row_bytes = cols * itemsize
    total_bytes = rows * row_bytes
    tile_cap_bytes, vmem_limit_bytes = _vmem_budget()

    # Biggest sublane-aligned row tile under the per-generation VMEM cap.
    max_rows = max(sublane, (tile_cap_bytes // row_bytes) // sublane * sublane)
    tile_rows = min(rows, max_rows)

    # Guarantee >= 2 grid blocks for mid/large slabs so the "parallel" grid
    # axis actually shards across v7x's 2 TensorCores (no-op on v5e/v6e).
    if total_bytes > _SPLIT_THRESHOLD_BYTES:
        half = -(-rows // 2)
        half = -(-half // sublane) * sublane
        tile_rows = min(tile_rows, max(sublane, half))

    grid = (pl.cdiv(rows, tile_rows),)

    return pl.pallas_call(
        _copy_kernel,
        out_shape=jax.ShapeDtypeStruct((rows, cols), x2.dtype),
        grid=grid,
        in_specs=[pl.BlockSpec((tile_rows, cols), lambda i: (i, 0))],
        out_specs=pl.BlockSpec((tile_rows, cols), lambda i: (i, 0)),
        # Identity forward: alias the output onto the (temporary) input slab.
        input_output_aliases={0: 0},
        compiler_params=pltpu.CompilerParams(
            dimension_semantics=("parallel",),
            vmem_limit_bytes=vmem_limit_bytes,
        ),
        cost_estimate=pl.CostEstimate(
            flops=0,
            transcendentals=0,
            bytes_accessed=2 * total_bytes,
        ),
    )(x2)


def lcnn_forward(x: jax.Array, *, run_kernel: bool = True) -> jax.Array:
    """Pallas implementation of LCNN.forward (stub -> identity pass-through).

    run_kernel=False takes the perf-review fast path (pure identity, zero HBM
    traffic).  Default True so the Pallas copy kernel is exercised.
    """
    if not run_kernel:
        return x

    orig_shape = x.shape
    total = int(x.size)
    if total == 0:
        return x

    itemsize = jnp.dtype(x.dtype).itemsize
    padded_total, rows, cols, sublane = _choose_layout(total, itemsize)

    flat = x.reshape(-1)
    if padded_total != total:
        flat = jnp.pad(flat, (0, padded_total - total))

    y2 = _identity_copy_2d(flat.reshape(rows, cols), sublane)

    y = y2.reshape(-1)
    if padded_total != total:
        y = y[:total]
    return y.reshape(orig_shape)


if __name__ == "__main__":
    key = jax.random.PRNGKey(0)
    # Small NCHW input consistent with a CNN-style forward signature.
    x = jax.random.normal(key, (2, 4, 16, 16), dtype=jnp.float32)

    # Host copy for the correctness check (the intermediate device slab may be
    # donated to the output via input_output_aliases).
    x_host = np.asarray(x)

    out = jax.block_until_ready(lcnn_forward(x))

    # Sanity check: identity semantics (the only defined behavior of the stub).
    assert out.shape == x_host.shape
    assert out.dtype == x_host.dtype
    assert np.allclose(np.asarray(out), x_host)

    print("KERNEL_OK")
</pallas_src>

<mosaic_0001>
module attributes {stable_mosaic.version = 11 : i64} {
  func.func @_copy_kernel(%arg0: i32, %arg1: memref<8x256xf32, #tpu.memory_space<vmem>>, %arg2: memref<8x256xf32, #tpu.memory_space<vmem>>) attributes {dimension_semantics = [#tpu.dimension_semantics<parallel>], iteration_bounds = array<i64: 1>, scalar_prefetch = 0 : i64, scratch_operands = 0 : i64, tpu.core_type = #tpu.core_type<tc>, window_params = [{transform_indices = @transform_0, window_bounds = array<i64: 8, 256>}, {transform_indices = @transform_1, window_bounds = array<i64: 8, 256>}]} {
    %c0 = arith.constant 0 : index
    %c0_0 = arith.constant 0 : index
    %0 = vector.load %arg1[%c0, %c0_0] : memref<8x256xf32, #tpu.memory_space<vmem>>, vector<8x256xf32>
    %c0_1 = arith.constant 0 : index
    %c0_2 = arith.constant 0 : index
    %1 = vector.load %arg2[%c0_1, %c0_2] : memref<8x256xf32, #tpu.memory_space<vmem>>, vector<8x256xf32>
    tpu.vector_store %arg2[%c0_1, %c0_2], %0 {strides = array<i32>} : memref<8x256xf32, #tpu.memory_space<vmem>>, vector<8x256xf32>,
    return
  }
  func.func @transform_0(%arg0: i32) -> (i32, i32) {
    %c0_i32 = arith.constant 0 : i32
    %c0_i32_0 = arith.constant 0 : i32
    return %arg0, %c0_i32 : i32, i32
  }
  func.func @transform_1(%arg0: i32) -> (i32, i32) {
    %c0_i32 = arith.constant 0 : i32
    %c0_i32_0 = arith.constant 0 : i32
    return %arg0, %c0_i32 : i32, i32
  }
}

</mosaic_0001>

<bundles_post_ra>
// kernel: tpu_custom_call.1
= control target key start
LH: loop header
LB: loop body
LE: loop exit
PB: predicated region body
PF: predicated region fallthrough
CT: control target
= control target key end

     0   :  { %6 = vsyncpa [#allocation3], 0  ;;  %s126_s0 = inlined_call_operand.hbm [shape: f32[8,256], index: 0, kind: input, shape index: {}, may-alias: {0,1}]   ;;  %s127_s1 = inlined_call_operand.hbm [shape: f32[8,256], index: 1, kind: output, shape index: {}, may-alias: {0,1}]  }
   0x1   :  { %7 = vsyncpa [#allocation4], 0  ;;  %s90_s6 = smov [#allocation2]   ;;  %s42_s10 = scalar_lea.hbm %s126_s0, 256 }
   0x2   :  { %s14_s7 = sshll.u32 %s90_s6, 4  ;;  %p43_p0 = scmp.ne.s32.totalorder %s126_s0, %s42_s10  ;;  %s15_s7 = int_to_ptr.vmem [resolvable:$true] %s14_s7 }
   0x3   :  { %p46_p1 = scmp.lt.u32.totalorder %s42_s10, %s126_s0 }
   0x5   :  { %p48_p2 = pnand %p46_p1, %p43_p0 }
   0x7   :  { %51 = shalt.err (!%p48_p2)
}
   0x8   :  { %s52_s15 = scalar_lea.vmem %s15_s7, 256  ;;  %p57_p4 = scmp.lt.s32.totalorder %s15_s7, %s15_s7 }
   0x9   :  { %p53_p3 = scmp.ne.s32.totalorder %s15_s7, %s52_s15  ;;  %p58_p5 = scmp.lt.s32.totalorder %s52_s15, %s52_s15 }
   0xb   :  { %p59_p6 = por %p58_p5, %p57_p4 }
   0xd   :  { %p60_p7 = pnand %p59_p6, %p53_p3 }
   0xf   :  { %63 = shalt.err (!%p60_p7)
}
  0x10   :  { %17 = dma.hbm_to_vmem [thread:$0]  %s126_s0, 256, %s15_s7, [#allocation3]  }
  0x11   :  { %86 = dma.done.wait [#allocation3], 256  }
  0x12   :  { %87 = vsyncadd [#allocation3], 4294967040  ;;  %s91_s18 = smov [#allocation5]   ;;  %v21_v0 = vld [vmem:[#allocation2] sm:$0xff]  ;;  %v22_v1 = vld [vmem:[#allocation2 + $0x8] sm:$0xff] }
  0x13   :  { %s31_s19 = sshll.u32 %s91_s18, 4  ;;  %23 = vst [vmem:[#allocation5] sm:$0xff] %v21_v0  ;;  %24 = vst [vmem:[#allocation5 + $0x8] sm:$0xff] %v22_v1  ;;  %s32_s19 = int_to_ptr.vmem [resolvable:$true] %s31_s19 }
  0x14   :  { %s64_s20 = scalar_lea.vmem %s32_s19, 256  ;;  %p69_p9 = scmp.lt.s32.totalorder %s32_s19, %s32_s19 }
  0x15   :  { %p65_p8 = scmp.ne.s32.totalorder %s32_s19, %s64_s20  ;;  %p70_p10 = scmp.lt.s32.totalorder %s64_s20, %s64_s20 }
  0x17   :  { %p71_p11 = por %p70_p10, %p69_p9 }
  0x19   :  { %p72_p12 = pnand %p71_p11, %p65_p8 }
  0x1b   :  { %75 = shalt.err (!%p72_p12)
}
  0x1c   :  { %s76_s0 = scalar_lea.hbm %s127_s1, 256 }
  0x1d   :  { %p77_p13 = scmp.ne.s32.totalorder %s127_s1, %s76_s0  ;;  %p80_p0 = scmp.lt.u32.totalorder %s76_s0, %s127_s1 }
  0x1f   :  { %p82_p1 = pnand %p80_p0, %p77_p13 }
  0x21   :  { %85 = shalt.err (!%p82_p1)
}
  0x22   :  { %34 = dma.vmem_to_hbm [thread:$0]  %s32_s19, 256, %s127_s1, [#allocation4]  }
  0x23   :  { %88 = dma.done.wait [#allocation4], 256  }
  0x24   :  { %89 = vsyncadd [#allocation4], 4294967040 }
  0x25   :  { %38 = vsyncpa [#allocation3], 1 }
  0x26   :  { %39 = vsyncpa [#allocation4], 1 }

</bundles_post_ra>
